<compile_context>
chip_gen: v5e
topology: v5e:2x2
jax: 0.10.0
libtpu: 0.0.40
codegen_flags: <defaults>
</compile_context>

<pallas_src>
import functools

import jax
import jax.numpy as jnp
from jax.experimental import pallas as pl
from jax.experimental.pallas import tpu as pltpu

_LANE = 128
_SUBLANE = 8


def _round_up(x, m):
    return (x + m - 1) // m * m


def _dqn_mlp_kernel(x_ref, w1_ref, b1_ref, w2_ref, b2_ref, w3_ref, b3_ref, o_ref):
    """One batch tile of the MLP. Weight/bias blocks are identical for every grid
    step, so they are DMA'd once and stay resident in VMEM."""
    x = x_ref[...]

    # Layer 1: matmul in the storage dtype (bf16 or f32), accumulate in f32.
    h1 = jnp.dot(x, w1_ref[...], preferred_element_type=jnp.float32) + b1_ref[...]
    h1 = jnp.maximum(h1, 0.0)          # bias add + ReLU kept in f32 (v5e-safe)

    # Layer 2
    h2 = jnp.dot(h1.astype(w2_ref.dtype), w2_ref[...],
                 preferred_element_type=jnp.float32) + b2_ref[...]
    h2 = jnp.maximum(h2, 0.0)

    # Output layer (lane-padded to 128 columns), no activation.
    out = jnp.dot(h2.astype(w3_ref.dtype), w3_ref[...],
                  preferred_element_type=jnp.float32) + b3_ref[...]
    o_ref[...] = out.astype(o_ref.dtype)


@functools.partial(jax.jit, static_argnames=("compute_dtype", "tile_b"))
def dqn_forward(x, w1, b1, w2, b2, w3, b3, *,
                compute_dtype=jnp.bfloat16, tile_b=512):
    batch, in_features = x.shape
    out_size = w3.shape[1]

    # ---- batch tiling: large row tiles amortize the ~0.35 us/step grid overhead.
    tb = min(tile_b, _round_up(batch, _SUBLANE))
    batch_p = _round_up(batch, tb)
    num_tiles = batch_p // tb

    # ---- lane-dense output: pad the narrow Q-value head to a full 128-lane tile.
    n_pad = _round_up(out_size, _LANE)
    w3p = jnp.zeros((w3.shape[0], n_pad), w3.dtype).at[:, :out_size].set(w3)
    b3p = jnp.zeros((1, n_pad), b3.dtype).at[:, :out_size].set(b3)

    # ---- matmul operands in compute_dtype; biases stay f32 (added to f32 acc).
    xp = jnp.zeros((batch_p, in_features), compute_dtype).at[:batch, :].set(
        x.astype(compute_dtype))
    w1c = w1.astype(compute_dtype)
    w2c = w2.astype(compute_dtype)
    w3c = w3p.astype(compute_dtype)
    b1c = b1.astype(jnp.float32)
    b2c = b2.astype(jnp.float32)
    b3c = b3p.astype(jnp.float32)

    def resident(arr):  # same block every grid step -> weights stay in VMEM
        return pl.BlockSpec(arr.shape, lambda i: (0, 0))

    out_p = pl.pallas_call(
        _dqn_mlp_kernel,
        out_shape=jax.ShapeDtypeStruct((batch_p, n_pad), jnp.float32),
        grid=(num_tiles,),
        in_specs=[
            pl.BlockSpec((tb, in_features), lambda i: (i, 0)),  # x: tiled over batch
            resident(w1c), resident(b1c),
            resident(w2c), resident(b2c),
            resident(w3c), resident(b3c),
        ],
        out_specs=pl.BlockSpec((tb, n_pad), lambda i: (i, 0)),
        compiler_params=pltpu.CompilerParams(
            dimension_semantics=("parallel",)),  # v7x: shard batch tiles across TCs
    )(xp, w1c, b1c, w2c, b2c, w3c, b3c)

    # Strip batch padding and the lane padding of the output head.
    return out_p[:batch, :out_size]
    # TODO(synk): for tiny online-inference batches, prefer plain XLA fusion or a
    # cross-call weight-residency scheme (P10) over a standalone pallas_call.


def init_linear_params(key, in_features, out_features):
    """Deterministic init mimicking PyTorch nn.Linear defaults (uniform +-1/sqrt(fan_in)).
    Weight stored as [in_features, out_features] (transpose of PyTorch layout)."""
    k_w, k_b = jax.random.split(key)
    bound = 1.0 / jnp.sqrt(jnp.float32(in_features))
    w = jax.random.uniform(k_w, (in_features, out_features), jnp.float32,
                           minval=-bound, maxval=bound)
    b = jax.random.uniform(k_b, (1, out_features), jnp.float32,
                           minval=-bound, maxval=bound)
    return w, b


def reference_forward(x, w1, b1, w2, b2, w3, b3):
    h1 = jnp.maximum(x @ w1 + b1, 0.0)
    h2 = jnp.maximum(h1 @ w2 + b2, 0.0)
    return h2 @ w3 + b3


if __name__ == "__main__":
    # DQNNetwork(input_size=32, hidden_sizes=[128, 64], output_size=4)
    input_size = 32
    hidden_sizes = [128, 64]
    output_size = 4

    key = jax.random.PRNGKey(0)
    k_x, k_xb, k1, k2, k3 = jax.random.split(key, 5)

    w1, b1 = init_linear_params(k1, input_size, hidden_sizes[0])
    w2, b2 = init_linear_params(k2, hidden_sizes[0], hidden_sizes[1])
    w3, b3 = init_linear_params(k3, hidden_sizes[1], output_size)

    # --- small batch (online action selection), exact f32 path ---
    batch = 2
    x = jax.random.normal(k_x, (batch, input_size), jnp.float32)
    out_f32 = dqn_forward(x, w1, b1, w2, b2, w3, b3, compute_dtype=jnp.float32)
    out_f32 = jax.block_until_ready(out_f32)
    ref = reference_forward(x, w1, b1, w2, b2, w3, b3)
    assert out_f32.shape == (batch, output_size)
    assert jnp.allclose(out_f32, ref, atol=1e-5, rtol=1e-5), "f32 mismatch vs reference"

    # --- small batch, bf16 matmul operands (recommended v6e/v7x path) ---
    out_bf16 = dqn_forward(x, w1, b1, w2, b2, w3, b3, compute_dtype=jnp.bfloat16)
    out_bf16 = jax.block_until_ready(out_bf16)
    assert jnp.allclose(out_bf16, ref, atol=5e-2, rtol=5e-2), "bf16 mismatch vs reference"

    # --- larger (replay-buffer-style) batch exercises the real grid/pipelined path,
    #     including batch padding to the tile size (1000 -> 1024 -> 2 grid steps). ---
    big_batch = 1000
    xb = jax.random.normal(k_xb, (big_batch, input_size), jnp.float32)
    out_big = dqn_forward(xb, w1, b1, w2, b2, w3, b3, compute_dtype=jnp.bfloat16)
    out_big = jax.block_until_ready(out_big)
    ref_big = reference_forward(xb, w1, b1, w2, b2, w3, b3)
    assert out_big.shape == (big_batch, output_size)
    assert jnp.allclose(out_big, ref_big, atol=5e-2, rtol=5e-2), "batched mismatch vs reference"

    print("KERNEL_OK")
</pallas_src>

<mosaic_0001>
module attributes {stable_mosaic.version = 11 : i64} {
  func.func @_dqn_mlp_kernel(%arg0: i32, %arg1: memref<8x32xf32, #tpu.memory_space<vmem>>, %arg2: memref<32x128xf32, #tpu.memory_space<vmem>>, %arg3: memref<1x128xf32, #tpu.memory_space<vmem>>, %arg4: memref<128x64xf32, #tpu.memory_space<vmem>>, %arg5: memref<1x64xf32, #tpu.memory_space<vmem>>, %arg6: memref<64x128xf32, #tpu.memory_space<vmem>>, %arg7: memref<1x128xf32, #tpu.memory_space<vmem>>, %arg8: memref<8x128xf32, #tpu.memory_space<vmem>>) attributes {dimension_semantics = [#tpu.dimension_semantics<parallel>], iteration_bounds = array<i64: 1>, scalar_prefetch = 0 : i64, scratch_operands = 0 : i64, tpu.core_type = #tpu.core_type<tc>, window_params = [{transform_indices = @transform_0, window_bounds = array<i64: 8, 32>}, {pipeline_mode = #tpu.pipeline_mode<synchronous>, transform_indices = @transform_1, window_bounds = array<i64: 32, 128>}, {pipeline_mode = #tpu.pipeline_mode<synchronous>, transform_indices = @transform_2, window_bounds = array<i64: 1, 128>}, {pipeline_mode = #tpu.pipeline_mode<synchronous>, transform_indices = @transform_3, window_bounds = array<i64: 128, 64>}, {pipeline_mode = #tpu.pipeline_mode<synchronous>, transform_indices = @transform_4, window_bounds = array<i64: 1, 64>}, {pipeline_mode = #tpu.pipeline_mode<synchronous>, transform_indices = @transform_5, window_bounds = array<i64: 64, 128>}, {pipeline_mode = #tpu.pipeline_mode<synchronous>, transform_indices = @transform_6, window_bounds = array<i64: 1, 128>}, {transform_indices = @transform_7, window_bounds = array<i64: 8, 128>}]} {
    %c0 = arith.constant 0 : index
    %c0_0 = arith.constant 0 : index
    %0 = vector.load %arg1[%c0, %c0_0] : memref<8x32xf32, #tpu.memory_space<vmem>>, vector<8x32xf32>
    %c0_1 = arith.constant 0 : index
    %c0_2 = arith.constant 0 : index
    %1 = vector.load %arg2[%c0_1, %c0_2] : memref<32x128xf32, #tpu.memory_space<vmem>>, vector<32x128xf32>
    %cst = arith.constant dense<0.000000e+00> : vector<8x128xf32>
    %2 = tpu.matmul %0, %1, %cst {dimension_numbers = #tpu.dot_dimension_numbers<[1], [0], [0], [1], [0, 0, 1, 1], [], []>} : vector<8x32xf32>, vector<32x128xf32>, vector<8x128xf32> -> vector<8x128xf32>
    %c0_3 = arith.constant 0 : index
    %c0_4 = arith.constant 0 : index
    %3 = vector.load %arg3[%c0_3, %c0_4] : memref<1x128xf32, #tpu.memory_space<vmem>>, vector<1x128xf32>
    %4 = vector.broadcast %3 : vector<1x128xf32> to vector<8x128xf32>
    %5 = arith.addf %2, %4 : vector<8x128xf32>
    %cst_5 = arith.constant 0.000000e+00 : f32
    %6 = vector.broadcast %cst_5 : f32 to vector<8x128xf32>
    %7 = arith.maximumf %5, %6 : vector<8x128xf32>
    %c0_6 = arith.constant 0 : index
    %c0_7 = arith.constant 0 : index
    %8 = vector.load %arg4[%c0_6, %c0_7] : memref<128x64xf32, #tpu.memory_space<vmem>>, vector<128x64xf32>
    %cst_8 = arith.constant dense<0.000000e+00> : vector<8x64xf32>
    %9 = tpu.matmul %7, %8, %cst_8 {dimension_numbers = #tpu.dot_dimension_numbers<[1], [0], [0], [1], [0, 0, 1, 1], [], []>} : vector<8x128xf32>, vector<128x64xf32>, vector<8x64xf32> -> vector<8x64xf32>
    %c0_9 = arith.constant 0 : index
    %c0_10 = arith.constant 0 : index
    %10 = vector.load %arg5[%c0_9, %c0_10] : memref<1x64xf32, #tpu.memory_space<vmem>>, vector<1x64xf32>
    %11 = vector.broadcast %10 : vector<1x64xf32> to vector<8x64xf32>
    %12 = arith.addf %9, %11 : vector<8x64xf32>
    %cst_11 = arith.constant 0.000000e+00 : f32
    %13 = vector.broadcast %cst_11 : f32 to vector<8x64xf32>
    %14 = arith.maximumf %12, %13 : vector<8x64xf32>
    %c0_12 = arith.constant 0 : index
    %c0_13 = arith.constant 0 : index
    %15 = vector.load %arg6[%c0_12, %c0_13] : memref<64x128xf32, #tpu.memory_space<vmem>>, vector<64x128xf32>
    %cst_14 = arith.constant dense<0.000000e+00> : vector<8x128xf32>
    %16 = tpu.matmul %14, %15, %cst_14 {dimension_numbers = #tpu.dot_dimension_numbers<[1], [0], [0], [1], [0, 0, 1, 1], [], []>} : vector<8x64xf32>, vector<64x128xf32>, vector<8x128xf32> -> vector<8x128xf32>
    %c0_15 = arith.constant 0 : index
    %c0_16 = arith.constant 0 : index
    %17 = vector.load %arg7[%c0_15, %c0_16] : memref<1x128xf32, #tpu.memory_space<vmem>>, vector<1x128xf32>
    %18 = vector.broadcast %17 : vector<1x128xf32> to vector<8x128xf32>
    %19 = arith.addf %16, %18 : vector<8x128xf32>
    %c0_17 = arith.constant 0 : index
    %c0_18 = arith.constant 0 : index
    %20 = vector.load %arg8[%c0_17, %c0_18] : memref<8x128xf32, #tpu.memory_space<vmem>>, vector<8x128xf32>
    tpu.vector_store %arg8[%c0_17, %c0_18], %19 {strides = array<i32>} : memref<8x128xf32, #tpu.memory_space<vmem>>, vector<8x128xf32>,
    return
  }
  func.func @transform_0(%arg0: i32) -> (i32, i32) {
    %c0_i32 = arith.constant 0 : i32
    %c0_i32_0 = arith.constant 0 : i32
    return %arg0, %c0_i32 : i32, i32
  }
  func.func @transform_1(%arg0: i32) -> (i32, i32) {
    %c0_i32 = arith.constant 0 : i32
    %c0_i32_0 = arith.constant 0 : i32
    %c0_i32_1 = arith.constant 0 : i32
    return %c0_i32, %c0_i32_0 : i32, i32
  }
  func.func @transform_2(%arg0: i32) -> (i32, i32) {
    %c0_i32 = arith.constant 0 : i32
    %c0_i32_0 = arith.constant 0 : i32
    %c0_i32_1 = arith.constant 0 : i32
    return %c0_i32, %c0_i32_0 : i32, i32
  }
  func.func @transform_3(%arg0: i32) -> (i32, i32) {
    %c0_i32 = arith.constant 0 : i32
    %c0_i32_0 = arith.constant 0 : i32
    %c0_i32_1 = arith.constant 0 : i32
    return %c0_i32, %c0_i32_0 : i32, i32
  }
  func.func @transform_4(%arg0: i32) -> (i32, i32) {
    %c0_i32 = arith.constant 0 : i32
    %c0_i32_0 = arith.constant 0 : i32
    %c0_i32_1 = arith.constant 0 : i32
    return %c0_i32, %c0_i32_0 : i32, i32
  }
  func.func @transform_5(%arg0: i32) -> (i32, i32) {
    %c0_i32 = arith.constant 0 : i32
    %c0_i32_0 = arith.constant 0 : i32
    %c0_i32_1 = arith.constant 0 : i32
    return %c0_i32, %c0_i32_0 : i32, i32
  }
  func.func @transform_6(%arg0: i32) -> (i32, i32) {
    %c0_i32 = arith.constant 0 : i32
    %c0_i32_0 = arith.constant 0 : i32
    %c0_i32_1 = arith.constant 0 : i32
    return %c0_i32, %c0_i32_0 : i32, i32
  }
  func.func @transform_7(%arg0: i32) -> (i32, i32) {
    %c0_i32 = arith.constant 0 : i32
    %c0_i32_0 = arith.constant 0 : i32
    return %arg0, %c0_i32 : i32, i32
  }
}

</mosaic_0001>

<bundles_post_ra>
// kernel: dqn_forward.1
= control target key start
LH: loop header
LB: loop body
LE: loop exit
PB: predicated region body
PF: predicated region fallthrough
CT: control target
= control target key end

     0   :  { %vm35_vm0 = vcmask 261120   ;;  %vm113_vm1 = vcmask 523264   ;;  %s286_s1 = inlined_call_operand.vmem [shape: f32[32,128], index: 1, kind: input, shape index: {}]   ;;  %s287_s3 = inlined_call_operand.vmem [shape: f32[128,64], index: 3, kind: input, shape index: {}]   ;;  %s288_s0 = inlined_call_operand.vmem [shape: f32[8,32], index: 0, kind: input, shape index: {}]   ;;  %s289_s2 = inlined_call_operand.vmem [shape: f32[1,128], index: 2, kind: input, shape index: {}]   ;;  %s290_s4 = inlined_call_operand.vmem [shape: f32[1,64], index: 4, kind: input, shape index: {}]   ;;  %s291_s5 = inlined_call_operand.vmem [shape: f32[64,128], index: 5, kind: input, shape index: {}]   ;;  %s292_s6 = inlined_call_operand.vmem [shape: f32[1,128], index: 6, kind: input, shape index: {}]   ;;  %s293_s7 = inlined_call_operand.vmem [shape: f32[8,128], index: 7, kind: output, shape index: {}]  }
   0x1   :  { %v30_v0 = vld [vmem:[%s286_s1 + $0x18] sm:$0xff]  ;;  %v29_v1 = vld [vmem:[%s286_s1 + $0x10] sm:$0xff]  ;;  %v28_v3 = vld [vmem:[%s286_s1 + $0x8] sm:$0xff] }
   0x2   :  { %51 = vmatpush.msra.mxu0 %v30_v0  ;;  %v75_v2 = vld [vmem:[%s287_s3 + $0x78] sm:$0xff]  ;;  %v74_v4 = vld [vmem:[%s287_s3 + $0x70] sm:$0xff]  ;;  %v73_v5 = vld [vmem:[%s287_s3 + $0x68] sm:$0xff] }
   0x3   :  { %80 = vmatpush.msra.mxu1 %v75_v2  ;;  %v27_v6 = vld [vmem:[%s286_s1] sm:$0xff]  ;;  %v71_v9 = vld [vmem:[%s287_s3 + $0x58] sm:$0xff]  ;;  %v70_v10 = vld [vmem:[%s287_s3 + $0x50] sm:$0xff] }
   0x4   :  { %52 = vmatpush.msra.mxu0 %v29_v1  ;;  %v26_v7 = vld [vmem:[%s288_s0] sm:$0xff]  ;;  %v69_v11 = vld [vmem:[%s287_s3 + $0x48] sm:$0xff]  ;;  %v67_v13 = vld [vmem:[%s287_s3 + $0x38] sm:$0xff] }
   0x5   :  { %81 = vmatpush.msra.mxu1 %v74_v4  ;;  %v72_v8 = vld [vmem:[%s287_s3 + $0x60] sm:$0xff]  ;;  %v66_v14 = vld [vmem:[%s287_s3 + $0x30] sm:$0xff]  ;;  %v65_v15 = vld [vmem:[%s287_s3 + $0x28] sm:$0xff] }
   0x6   :  { %53 = vmatpush.msra.mxu0 %v28_v3  ;;  %v68_v12 = vld [vmem:[%s287_s3 + $0x40] sm:$0xff]  ;;  %v63_v17 = vld [vmem:[%s287_s3 + $0x18] sm:$0xff]  ;;  %v62_v18 = vld [vmem:[%s287_s3 + $0x10] sm:$0xff] }
   0x7   :  { %82 = vmatpush.msra.mxu1 %v73_v5  ;;  %v64_v16 = vld [vmem:[%s287_s3 + $0x20] sm:$0xff]  ;;  %v61_v19 = vld [vmem:[%s287_s3 + $0x8] sm:$0xff]  ;;  %v108_v21 = vld [vmem:[%s291_s5 + $0x38] sm:$0xff] }
   0x8   :  { %54 = vmatpush.msra.mxu0 %v27_v6  ;;  %v60_v20 = vld [vmem:[%s287_s3] sm:$0xff]  ;;  %v107_v22 = vld [vmem:[%s291_s5 + $0x30] sm:$0xff]  ;;  %125 = vmatpush.msra.mxu2 %v108_v21  ;;  %v106_v23 = vld [vmem:[%s291_s5 + $0x28] sm:$0xff] }
   0x9   :  { %142 = vmatmul.msk.f32.vlgmr.msra.gmra.mxu0 %vm35_vm0, %v26_v7  ;;  %83 = vmatpush.msra.mxu1 %v72_v8  ;;  %v105_v24 = vld [vmem:[%s291_s5 + $0x20] sm:$0xff]  ;;  %v104_v25 = vld [vmem:[%s291_s5 + $0x18] sm:$0xff]  ;;  %v103_v30 = vld [vmem:[%s291_s5 + $0x10] sm:$0xff] }
   0xa   :  { %126 = vmatpush.msra.mxu2 %v107_v22  ;;  %v144_v26 = vld [vmem:[%s289_s2] ss:$0 sm:$0xff]  ;;  %v102_v31 = vld [vmem:[%s291_s5 + $0x8] sm:$0xff] }
   0xb   :  { %84 = vmatpush.msra.mxu1 %v71_v9  ;;  %v101_v32 = vld [vmem:[%s291_s5] sm:$0xff] }
   0xc   :  { %127 = vmatpush.msra.mxu2 %v106_v23  ;;  %v145_v33 = vld [vmem:[%s290_s4] ss:$0 sm:$0xff] }
   0xd   :  { %85 = vmatpush.msra.mxu1 %v70_v10  ;;  %v146_v37 = vld [vmem:[%s292_s6] ss:$0 sm:$0xff] }
   0xe   :  { %128 = vmatpush.msra.mxu2 %v105_v24 }
   0xf   :  { %86 = vmatpush.msra.mxu1 %v69_v11 }
  0x10   :  { %129 = vmatpush.msra.mxu2 %v104_v25 }
  0x11   :  { %87 = vmatpush.msra.mxu1 %v68_v12 }
  0x12   :  { %130 = vmatpush.msra.mxu2 %v103_v30 }
  0x13   :  { %88 = vmatpush.msra.mxu1 %v67_v13 }
  0x14   :  { %131 = vmatpush.msra.mxu2 %v102_v31 }
  0x15   :  { %89 = vmatpush.msra.mxu1 %v66_v14 }
  0x16   :  { %132 = vmatpush.msra.mxu2 %v101_v32 }
  0x17   :  { %90 = vmatpush.msra.mxu1 %v65_v15 }
  0x19   :  { %91 = vmatpush.msra.mxu1 %v64_v16 }
  0x1b   :  { %92 = vmatpush.msra.mxu1 %v63_v17 }
  0x1d   :  { %93 = vmatpush.msra.mxu1 %v62_v18 }
  0x1f   :  { %94 = vmatpush.msra.mxu1 %v61_v19 }
  0x21   :  { %95 = vmatpush.msra.mxu1 %v60_v20 }
  0x86   :  { %v56_v27 = vpop.f32.mrf.mxu0 }
  0x87   :  { %v57_v28 = vadd.f32 %v144_v26, %v56_v27 }
  0x89   :  { %v59_v29 = vmax.f32 %v57_v28, 0.0 }
  0x8b   :  { %96 = vmatmul.f32.vlgmr.msra.gmra.mxu1 %v59_v29 }
 0x108   :  { %v97_v34 = vpop.f32.mrf.mxu1 }
 0x109   :  { %v98_v35 = vadd.f32 %v145_v33, %v97_v34 }
 0x10b   :  { %v100_v36 = vmax.f32 %v98_v35, 0.0 }
 0x10d   :  { %143 = vmatmul.msk.f32.vlgmr.msra.gmra.mxu2 %vm113_vm1, %v100_v36 }
 0x190   :  { %v134_v38 = vpop.f32.mrf.mxu2 }
 0x191   :  { %v135_v39 = vadd.f32 %v146_v37, %v134_v38 }
 0x193   :  { %137 = vst [vmem:[%s293_s7] sm:$0xff] %v135_v39 }

</bundles_post_ra>
